<compile_context>
chip_gen: v5e
topology: v5e:2x2
jax: 0.10.0
libtpu: 0.0.40
codegen_flags: <defaults>
</compile_context>

<pallas_src>
import functools
import math

import jax
import jax.numpy as jnp
from jax import lax
from jax.experimental import pallas as pl
from jax.experimental.pallas import tpu as pltpu


def _round_up(x, m):
    return (x + m - 1) // m * m


# --------------------- kernel 1: attention weights (tiny) ---------------------

def _sparsemax_rows(z):
    """Sparsemax along the last axis of a 2-D f32 array (sort-free, O(N^2)).

    i is in the support iff 1 + rank_i * z_i > sum_{j: z_j >= z_i} z_j with
    rank_i = #{j: z_j >= z_i}.  N (number of agents) is tiny, so the pairwise
    pass is a handful of VPU ops (static unroll).
    """
    n = z.shape[-1]
    rank = jnp.zeros_like(z)
    gsum = jnp.zeros_like(z)
    for j in range(n):                      # static unroll, n is small
        zj = z[:, j:j + 1]                  # (M, 1)
        ge = (zj >= z).astype(z.dtype)      # (M, N): z_j >= z_i
        rank = rank + ge
        gsum = gsum + ge * zj
    support = (1.0 + rank * z > gsum).astype(z.dtype)
    k_sz = jnp.sum(support, axis=-1, keepdims=True)          # always >= 1
    tau = (jnp.sum(support * z, axis=-1, keepdims=True) - 1.0) / k_sz
    return jnp.maximum(z - tau, 0.0)


def _attn_weights_kernel(q_ref, k_ref, attn_ref, *, scale, sparse):
    # q_ref: (1, Nq, D), k_ref: (1, N, D), attn_ref: (1, Nq, N) f32
    q = q_ref[0]                            # (Nq, D)
    k = k_ref[0]                            # (N, D)
    s = lax.dot_general(q, k, (((1,), (1,)), ((), ())),
                        preferred_element_type=jnp.float32) * scale
    if sparse:
        p = _sparsemax_rows(s)
    else:
        s = s - jnp.max(s, axis=-1, keepdims=True)
        e = jnp.exp(s)
        p = e / jnp.sum(e, axis=-1, keepdims=True)
    attn_ref[0] = p


# ----------------- kernel 2: weighted sum over keys (HBM-bound) -----------------

def _weighted_sum_kernel(p_ref, v_ref, out_ref, *, n):
    # p_ref: SMEM (B, N) f32 (scalar prefetch)
    # v_ref: (1, N, TILE_ROWS, 128), out_ref: (1, TILE_ROWS, 128)
    bi = pl.program_id(0)
    acc = p_ref[bi, 0] * v_ref[0, 0].astype(jnp.float32)
    for j in range(1, n):                   # static unroll, n is small
        acc = acc + p_ref[bi, j] * v_ref[0, j].astype(jnp.float32)
    out_ref[0] = acc.astype(out_ref.dtype)


# ----------------------------------- wrapper -----------------------------------

def scaled_dot_product_attention(q, k, v, temperature, *, sparse=True,
                                 value_dtype=None,
                                 vmem_budget_bytes=32 * 1024 * 1024,
                                 v_buffers=2):
    """q: (B, 1, D), k: (B, N, D), v: (B, N, C, H, W) -> ((B, C, H, W), (B, 1, N))."""
    b, nq, d = q.shape
    _, n, dk = k.shape
    assert dk == d and v.shape[0] == b and v.shape[1] == n
    # TODO(synk): only the single-query case (Nq == 1) is supported; for Nq > 1
    # the PyTorch module broadcasts attn against v's channel dim, a path the
    # reference repo never exercises.
    assert nq == 1, "ScaledDotProductAttention kernel expects one query per batch"

    # ---- kernel 1: (B, 1, N) attention weights, one tiny grid step per batch ----
    attn_t = pl.pallas_call(
        functools.partial(_attn_weights_kernel,
                          scale=1.0 / float(temperature), sparse=bool(sparse)),
        out_shape=jax.ShapeDtypeStruct((b, nq, n), jnp.float32),
        grid=(b,),
        in_specs=[pl.BlockSpec((1, nq, d), lambda i: (i, 0, 0)),
                  pl.BlockSpec((1, n, d), lambda i: (i, 0, 0))],
        out_specs=pl.BlockSpec((1, nq, n), lambda i: (i, 0, 0)),
        compiler_params=pltpu.CompilerParams(dimension_semantics=("parallel",)),
    )(q, k)

    # ---- kernel 2: weighted sum over the N keys, streaming v ----
    if value_dtype is not None:
        v = v.astype(value_dtype)           # bf16 halves traffic on the v stream
    out_dtype = v.dtype
    spatial = v.shape[2:]
    f = int(math.prod(spatial))
    itemsize = jnp.dtype(out_dtype).itemsize

    # Tile selection from a VMEM byte budget: per (1,128) lane-slab we keep
    # v_buffers v buffers + a double-buffered output row.
    rows = -(-f // 128)
    per_row = v_buffers * n * 128 * itemsize + 2 * 128 * itemsize
    max_rows = max(16, (vmem_budget_bytes // per_row) // 16 * 16)
    tile_rows = min(_round_up(rows, 16), max_rows)   # 16-row aligned: dense for f32 & bf16
    rows_pad = _round_up(rows, tile_rows)
    grid_f = rows_pad // tile_rows
    f_pad = rows_pad * 128
    vmem_limit = max(per_row * tile_rows + (4 << 20), 16 << 20)

    v2 = v.reshape(b, n, f)
    if f_pad != f:
        v2 = jnp.pad(v2, ((0, 0), (0, 0), (0, f_pad - f)))
    v4 = v2.reshape(b, n, rows_pad, 128)

    p_flat = attn_t.reshape(b, n).astype(jnp.float32)   # rides in SMEM

    v_spec_kwargs = {}
    if v_buffers != 2:                     # optionally deepen the v pipeline (e.g. v7x)
        v_spec_kwargs["pipeline_mode"] = pl.Buffered(v_buffers)

    out = pl.pallas_call(
        functools.partial(_weighted_sum_kernel, n=n),
        out_shape=jax.ShapeDtypeStruct((b, rows_pad, 128), out_dtype),
        grid_spec=pltpu.PrefetchScalarGridSpec(
            num_scalar_prefetch=1,
            grid=(b, grid_f),
            in_specs=[pl.BlockSpec((1, n, tile_rows, 128),
                                   lambda i, j, p: (i, 0, j, 0),
                                   **v_spec_kwargs)],
            out_specs=pl.BlockSpec((1, tile_rows, 128),
                                   lambda i, j, p: (i, j, 0)),
        ),
        compiler_params=pltpu.CompilerParams(
            dimension_semantics=("parallel", "parallel"),
            vmem_limit_bytes=int(vmem_limit),
        ),
    )(p_flat, v4)

    out = out.reshape(b, f_pad)[:, :f].reshape((b,) + spatial)
    return out, attn_t


# ----------------------------- pure-JAX reference -----------------------------

def _sparsemax_ref(z, axis):
    z = jnp.moveaxis(z, axis, -1)
    zs = -jnp.sort(-z, axis=-1)                     # descending
    css = jnp.cumsum(zs, axis=-1)
    n = z.shape[-1]
    rng = jnp.arange(1, n + 1, dtype=z.dtype)
    support = (1.0 + rng * zs) > css
    k = jnp.sum(support, axis=-1, keepdims=True)
    css_k = jnp.take_along_axis(css, k.astype(jnp.int32) - 1, axis=-1)
    tau = (css_k - 1.0) / k
    p = jnp.maximum(z - tau, 0.0)
    return jnp.moveaxis(p, -1, axis)


def _reference_forward(q, k, v, temperature, sparse):
    attn_orig = jnp.einsum("bnd,bmd->bnm", k, q) / temperature   # bmm(k, q^T)
    if sparse:
        attn_orig = _sparsemax_ref(attn_orig, axis=1)
    else:
        attn_orig = jax.nn.softmax(attn_orig, axis=1)
    attn = attn_orig[:, :, :, None, None]                        # (B, N, Nq, 1, 1)
    out = (attn * v).sum(axis=1)                                  # (B, C, H, W)
    return out, jnp.swapaxes(attn_orig, 1, 2)


if __name__ == "__main__":
    # Small when2com-like config: 6 agents, 128-d keys, one query per batch
    # element, 8x16x16 value feature maps (F = 2048 -> single grid step per batch).
    batch, n_agents, n_query, key_dim = 2, 6, 1, 128
    c, h, w = 8, 16, 16
    temperature = key_dim ** 0.5

    root = jax.random.PRNGKey(0)
    kq, kk, kv = jax.random.split(root, 3)
    q = jax.random.normal(kq, (batch, n_query, key_dim), jnp.float32)
    k = jax.random.normal(kk, (batch, n_agents, key_dim), jnp.float32)
    v = jax.random.normal(kv, (batch, n_agents, c, h, w), jnp.float32)

    for sparse in (True, False):
        out, attn_t = scaled_dot_product_attention(q, k, v, temperature, sparse=sparse)
        out = jax.block_until_ready(out)
        attn_t = jax.block_until_ready(attn_t)

        ref_out, ref_attn_t = _reference_forward(q, k, v, temperature, sparse)
        assert out.shape == (batch, c, h, w)
        assert attn_t.shape == (batch, n_query, n_agents)
        assert jnp.allclose(out, ref_out, atol=1e-4, rtol=1e-4), sparse
        assert jnp.allclose(attn_t, ref_attn_t, atol=1e-5, rtol=1e-5), sparse

    # bf16 value stream (halves HBM traffic on the dominant v read / out write);
    # scores, sparsemax, and accumulation stay f32.
    out_bf16, attn_bf16 = scaled_dot_product_attention(
        q, k, v, temperature, sparse=True, value_dtype=jnp.bfloat16)
    out_bf16 = jax.block_until_ready(out_bf16)
    ref_out, ref_attn_t = _reference_forward(q, k, v, temperature, True)
    assert out_bf16.dtype == jnp.bfloat16
    assert jnp.allclose(out_bf16.astype(jnp.float32), ref_out, atol=5e-2, rtol=5e-2)
    assert jnp.allclose(attn_bf16, ref_attn_t, atol=1e-5, rtol=1e-5)

    print("KERNEL_OK")
</pallas_src>

<mosaic_0001>
module attributes {stable_mosaic.version = 11 : i64} {
  func.func @_attn_weights_kernel(%arg0: i32, %arg1: memref<1x1x128xf32, #tpu.memory_space<vmem>>, %arg2: memref<1x6x128xf32, #tpu.memory_space<vmem>>, %arg3: memref<1x1x6xf32, #tpu.memory_space<vmem>>) attributes {dimension_semantics = [#tpu.dimension_semantics<parallel>], iteration_bounds = array<i64: 2>, scalar_prefetch = 0 : i64, scratch_operands = 0 : i64, tpu.core_type = #tpu.core_type<tc>, window_params = [{transform_indices = @transform_0, window_bounds = array<i64: 1, 1, 128>}, {transform_indices = @transform_1, window_bounds = array<i64: 1, 6, 128>}, {transform_indices = @transform_2, window_bounds = array<i64: 1, 1, 6>}]} {
    %c0 = arith.constant 0 : index
    %c0_0 = arith.constant 0 : index
    %c0_1 = arith.constant 0 : index
    %0 = vector.load %arg1[%c0, %c0_0, %c0_1] : memref<1x1x128xf32, #tpu.memory_space<vmem>>, vector<1x1x128xf32>
    %1 = vector.shape_cast %0 : vector<1x1x128xf32> to vector<1x128xf32>
    %c0_2 = arith.constant 0 : index
    %c0_3 = arith.constant 0 : index
    %c0_4 = arith.constant 0 : index
    %2 = vector.load %arg2[%c0_2, %c0_3, %c0_4] : memref<1x6x128xf32, #tpu.memory_space<vmem>>, vector<1x6x128xf32>
    %3 = vector.shape_cast %2 : vector<1x6x128xf32> to vector<6x128xf32>
    %cst = arith.constant dense<0.000000e+00> : vector<1x6xf32>
    %4 = tpu.matmul %1, %3, %cst {dimension_numbers = #tpu.dot_dimension_numbers<[1], [1], [0], [0], [0, 0, 1, 0], [], []>} : vector<1x128xf32>, vector<6x128xf32>, vector<1x6xf32> -> vector<1x6xf32>
    %cst_5 = arith.constant 0.0883883461 : f32
    %5 = vector.broadcast %cst_5 : f32 to vector<1x6xf32>
    %6 = arith.mulf %4, %5 : vector<1x6xf32>
    %cst_6 = arith.constant 0.000000e+00 : f32
    %7 = vector.broadcast %cst_6 : f32 to vector<1x6xf32>
    %cst_7 = arith.constant 0.000000e+00 : f32
    %8 = vector.broadcast %cst_7 : f32 to vector<1x6xf32>
    %9 = vector.extract_strided_slice %6 {offsets = [0, 0], sizes = [1, 1], strides = [1, 1]} : vector<1x6xf32> to vector<1x1xf32>
    %10 = vector.broadcast %9 : vector<1x1xf32> to vector<1x6xf32>
    %11 = arith.cmpf oge, %10, %6 : vector<1x6xf32>
    %12 = arith.extui %11 : vector<1x6xi1> to vector<1x6xi32>
    %13 = arith.sitofp %12 : vector<1x6xi32> to vector<1x6xf32>
    %14 = arith.addf %7, %13 : vector<1x6xf32>
    %15 = vector.broadcast %9 : vector<1x1xf32> to vector<1x6xf32>
    %16 = arith.mulf %13, %15 : vector<1x6xf32>
    %17 = arith.addf %8, %16 : vector<1x6xf32>
    %18 = vector.extract_strided_slice %6 {offsets = [0, 1], sizes = [1, 1], strides = [1, 1]} : vector<1x6xf32> to vector<1x1xf32>
    %19 = vector.broadcast %18 : vector<1x1xf32> to vector<1x6xf32>
    %20 = arith.cmpf oge, %19, %6 : vector<1x6xf32>
    %21 = arith.extui %20 : vector<1x6xi1> to vector<1x6xi32>
    %22 = arith.sitofp %21 : vector<1x6xi32> to vector<1x6xf32>
    %23 = arith.addf %14, %22 : vector<1x6xf32>
    %24 = vector.broadcast %18 : vector<1x1xf32> to vector<1x6xf32>
    %25 = arith.mulf %22, %24 : vector<1x6xf32>
    %26 = arith.addf %17, %25 : vector<1x6xf32>
    %27 = vector.extract_strided_slice %6 {offsets = [0, 2], sizes = [1, 1], strides = [1, 1]} : vector<1x6xf32> to vector<1x1xf32>
    %28 = vector.broadcast %27 : vector<1x1xf32> to vector<1x6xf32>
    %29 = arith.cmpf oge, %28, %6 : vector<1x6xf32>
    %30 = arith.extui %29 : vector<1x6xi1> to vector<1x6xi32>
    %31 = arith.sitofp %30 : vector<1x6xi32> to vector<1x6xf32>
    %32 = arith.addf %23, %31 : vector<1x6xf32>
    %33 = vector.broadcast %27 : vector<1x1xf32> to vector<1x6xf32>
    %34 = arith.mulf %31, %33 : vector<1x6xf32>
    %35 = arith.addf %26, %34 : vector<1x6xf32>
    %36 = vector.extract_strided_slice %6 {offsets = [0, 3], sizes = [1, 1], strides = [1, 1]} : vector<1x6xf32> to vector<1x1xf32>
    %37 = vector.broadcast %36 : vector<1x1xf32> to vector<1x6xf32>
    %38 = arith.cmpf oge, %37, %6 : vector<1x6xf32>
    %39 = arith.extui %38 : vector<1x6xi1> to vector<1x6xi32>
    %40 = arith.sitofp %39 : vector<1x6xi32> to vector<1x6xf32>
    %41 = arith.addf %32, %40 : vector<1x6xf32>
    %42 = vector.broadcast %36 : vector<1x1xf32> to vector<1x6xf32>
    %43 = arith.mulf %40, %42 : vector<1x6xf32>
    %44 = arith.addf %35, %43 : vector<1x6xf32>
    %45 = vector.extract_strided_slice %6 {offsets = [0, 4], sizes = [1, 1], strides = [1, 1]} : vector<1x6xf32> to vector<1x1xf32>
    %46 = vector.broadcast %45 : vector<1x1xf32> to vector<1x6xf32>
    %47 = arith.cmpf oge, %46, %6 : vector<1x6xf32>
    %48 = arith.extui %47 : vector<1x6xi1> to vector<1x6xi32>
    %49 = arith.sitofp %48 : vector<1x6xi32> to vector<1x6xf32>
    %50 = arith.addf %41, %49 : vector<1x6xf32>
    %51 = vector.broadcast %45 : vector<1x1xf32> to vector<1x6xf32>
    %52 = arith.mulf %49, %51 : vector<1x6xf32>
    %53 = arith.addf %44, %52 : vector<1x6xf32>
    %54 = vector.extract_strided_slice %6 {offsets = [0, 5], sizes = [1, 1], strides = [1, 1]} : vector<1x6xf32> to vector<1x1xf32>
    %55 = vector.broadcast %54 : vector<1x1xf32> to vector<1x6xf32>
    %56 = arith.cmpf oge, %55, %6 : vector<1x6xf32>
    %57 = arith.extui %56 : vector<1x6xi1> to vector<1x6xi32>
    %58 = arith.sitofp %57 : vector<1x6xi32> to vector<1x6xf32>
    %59 = arith.addf %50, %58 : vector<1x6xf32>
    %60 = vector.broadcast %54 : vector<1x1xf32> to vector<1x6xf32>
    %61 = arith.mulf %58, %60 : vector<1x6xf32>
    %62 = arith.addf %53, %61 : vector<1x6xf32>
    %63 = arith.mulf %59, %6 : vector<1x6xf32>
    %cst_8 = arith.constant 1.000000e+00 : f32
    %64 = vector.broadcast %cst_8 : f32 to vector<1x6xf32>
    %65 = arith.addf %64, %63 : vector<1x6xf32>
    %66 = arith.cmpf ogt, %65, %62 : vector<1x6xf32>
    %67 = arith.extui %66 : vector<1x6xi1> to vector<1x6xi32>
    %68 = arith.sitofp %67 : vector<1x6xi32> to vector<1x6xf32>
    %cst_9 = arith.constant dense<0.000000e+00> : vector<1xf32>
    %69 = vector.multi_reduction <add>, %68, %cst_9 [1] : vector<1x6xf32> to vector<1xf32>
    %70 = vector.shape_cast %69 : vector<1xf32> to vector<1x1xf32>
    %71 = arith.mulf %68, %6 : vector<1x6xf32>
    %cst_10 = arith.constant dense<0.000000e+00> : vector<1xf32>
    %72 = vector.multi_reduction <add>, %71, %cst_10 [1] : vector<1x6xf32> to vector<1xf32>
    %73 = vector.shape_cast %72 : vector<1xf32> to vector<1x1xf32>
    %cst_11 = arith.constant 1.000000e+00 : f32
    %74 = vector.broadcast %cst_11 : f32 to vector<1x1xf32>
    %75 = arith.subf %73, %74 : vector<1x1xf32>
    %76 = arith.divf %75, %70 : vector<1x1xf32>
    %77 = vector.broadcast %76 : vector<1x1xf32> to vector<1x6xf32>
    %78 = arith.subf %6, %77 : vector<1x6xf32>
    %cst_12 = arith.constant 0.000000e+00 : f32
    %79 = vector.broadcast %cst_12 : f32 to vector<1x6xf32>
    %80 = arith.maximumf %78, %79 : vector<1x6xf32>
    %c0_13 = arith.constant 0 : index
    %c0_14 = arith.constant 0 : index
    %c0_15 = arith.constant 0 : index
    %81 = vector.load %arg3[%c0_13, %c0_14, %c0_15] : memref<1x1x6xf32, #tpu.memory_space<vmem>>, vector<1x1x6xf32>
    %82 = vector.shape_cast %81 : vector<1x1x6xf32> to vector<1x6xf32>
    %83 = vector.shape_cast %80 : vector<1x6xf32> to vector<1x1x6xf32>
    tpu.vector_store %arg3[%c0_13, %c0_14, %c0_15], %83 {strides = array<i32>} : memref<1x1x6xf32, #tpu.memory_space<vmem>>, vector<1x1x6xf32>,
    return
  }
  func.func @transform_0(%arg0: i32) -> (i32, i32, i32) {
    %c0_i32 = arith.constant 0 : i32
    %c0_i32_0 = arith.constant 0 : i32
    %c0_i32_1 = arith.constant 0 : i32
    return %arg0, %c0_i32, %c0_i32_0 : i32, i32, i32
  }
  func.func @transform_1(%arg0: i32) -> (i32, i32, i32) {
    %c0_i32 = arith.constant 0 : i32
    %c0_i32_0 = arith.constant 0 : i32
    %c0_i32_1 = arith.constant 0 : i32
    return %arg0, %c0_i32, %c0_i32_0 : i32, i32, i32
  }
  func.func @transform_2(%arg0: i32) -> (i32, i32, i32) {
    %c0_i32 = arith.constant 0 : i32
    %c0_i32_0 = arith.constant 0 : i32
    %c0_i32_1 = arith.constant 0 : i32
    return %arg0, %c0_i32, %c0_i32_0 : i32, i32, i32
  }
}

</mosaic_0001>

<bundles_post_ra>
// kernel: tpu_custom_call.1
= control target key start
LH: loop header
LB: loop body
LE: loop exit
PB: predicated region body
PF: predicated region fallthrough
CT: control target
= control target key end

     0   :  { %7 = vsyncpa [#allocation3], 0  ;;  %s609_s0 = inlined_call_operand.vmem [shape: f32[2,1,128], index: 0, kind: input, shape index: {}]   ;;  %s610_s1 = inlined_call_operand.vmem [shape: f32[2,6,128], index: 1, kind: input, shape index: {}]   ;;  %s611_s2 = inlined_call_operand.hbm [shape: f32[2,1,6], index: 2, kind: output, shape index: {}]  }
   0x1   :  { %9 = vsyncpa [#allocation3 + $0x1], 0  ;;  %s501_s9 = smov 0   ;;  %s503_s10 = smov 0  }
   0x2   :  { %s505_s11 = smov 0   ;;  %s507_s12 = smov 0  }
   0x3 LB: > { %s522_s13 = sadd.s32 4294967295, %s477_s12   ;;  %s345_s14 = sadd.s32 4294967294, %s477_s12   ;;  %s477_s12 = sphi %s507_s12, %s617_s12   ;;  %s473_s11 = sphi %s505_s11, %s616_s11   ;;  %s469_s10 = sphi %s503_s10, %s615_s10   ;;  %s465_s9 = sphi %s501_s9, %s614_s9  }
   0x4   : > { %s526_s15 = sadd.s32 1, %s477_s12   ;;  %s74_s16 = sadd.s32 1, %s473_s11 }
   0x5   : > { %s71_s17 = ssub.s32 %s477_s12, %s526_s15  ;;  %p84_p0 = scmp.ne.s32.totalorder %s473_s11, %s469_s10 }
   0x6   : > { %p72_p1 = scmp.eq.s32.totalorder %s71_s17, 0  ;;  %p85_p2 = scmp.eq.s32.totalorder %s522_s13, 1 }
   0x7   : > { %p90_p3 = scmp.ne.s32.totalorder %s469_s10, %s465_s9  ;;  %p91_p4 = scmp.eq.s32.totalorder %s345_s14, 1 }
   0x8   : > { %s537_s18 = scalar_select %p72_p1, %s473_s11, %s74_s16  }
   0x9   : > { %p539_p5 = por %p85_p2, %p84_p0  ;;  %p543_p6 = por %p91_p4, %p90_p3 }
   0xa   : > { %p348_p7 = scmp.ge.s32.totalorder %s477_s12, 1  ;;  %p122_p8 = scmp.lt.s32.totalorder %s477_s12, 3 }
   0xc   : > { %p123_p9 = pnand %p348_p7, %p122_p8 }
   0xd   : > { %p145_p10 = scmp.lt.s32.totalorder (!%p123_p9), %s522_s13, 1  ;;  %s143_s29 = sand.u32 (!%p123_p9), 1, %s469_s10  }
   0xe   : > { %126 = sbr.rel (%p123_p9) target bundleno = 441 (0x1b9), region = 28  ;;  %s277_s4 = scalar_lea.hbm (!%p123_p9), %s611_s2, %s522_s13 }
   0xf   : > { %s144_s5 = scalar_lea.vmem (!%p123_p9), [#allocation2], %s143_s29  ;;  %s281_s7 = sshll.u32 (!%p123_p9), %s277_s4, 4  ;;  %s282_s7 = int_to_ptr.hbm [resolvable:$true] %s281_s7 }
  0x10   : > { %s279_s6 = sshll.u32 (!%p123_p9), %s144_s5, 4  ;;  %s269_s8 = scalar_lea.sflag (!%p123_p9), [#allocation3], %s143_s29  ;;  %s280_s6 = int_to_ptr.vmem [resolvable:$true] %s279_s6 }
  0x11   : > { %s429_s14 = sshra.s32 (!%p123_p9), %s282_s7, 4  ;;  %s430_s14 = int_to_ptr.hbm [resolvable:$true] %s429_s14 }
  0x12   : > { %s431_s16 = scalar_lea.hbm (!%p123_p9), %s430_s14, 1  ;;  %p436_p0 = scmp.lt.s32.totalorder (!%p123_p9), %s430_s14, %s611_s2 }
  0x13   : > { %s146_s21 = scalar_select %p145_p10, %s522_s13, 1  ;;  %v479_v2 = vmov 4   ;;  %v480_v3 = vmov 2   ;;  %v481_v4 = vmov 0   ;;  %v482_v7 = vmov 5  }
  0x14   : > { %410 = vset.pattern.permute.xlu2 %v479_v2  ;;  %408 = vset.pattern.permute.xlu1 %v480_v3  ;;  %v483_v8 = vmov 3   ;;  %v484_v9 = vmov 1   ;;  %v485_v13 = vmov 0.0   ;;  %vm241_vm6 = vcmask 40960   ;;  %p432_p11 = scmp.ne.s32.totalorder %s430_s14, %s431_s16 }
  0x15   : > { %s349_s22 = sshll.u32 %s146_s21, 3  ;;  %s147_s25 = scalar_lea.vmem %s609_s0, %s146_s21  ;;  %406 = vset.pattern.permute.xlu0 %v481_v4 }
  0x16   : > { %s151_s28 = scalar_lea.vmem %s610_s1, %s349_s22  ;;  %v152_v1 = vld [vmem:[%s147_s25] sm:$0x1]  ;;  %p433_p12 = pnand %p432_p11, %p539_p5 }
  0x17   : > { %v153_v0 = vld [vmem:[%s151_s28] sm:$0x3f]  ;;  %s435_s21 = scalar_lea.hbm %s611_s2, 2 }
  0x18   : > { %169 = vmatpush.xpose.msra.mxu0 %v153_v0  ;;  %p434_p13 = pneg %p433_p12  ;;  %p437_p1 = scmp.lt.s32.totalorder %s435_s21, %s431_s16 }
  0x1a   : > { %p438_p2 = por %p437_p1, %p436_p0 }
  0x1b   : > { %170 = vmatmul.f32.vlgmr.msra.gmra.mxu0 %v152_v1 }
  0x1c   : > { %p439_p3 = pnand %p438_p2, %p434_p13 }
  0x98   : > { %v171_v5 = vpop.f32.mrf.mxu0 }
  0x99   : > { %v557_v6 = vmul.f32 0.088388346, %v171_v5 }
  0x9b   : > { %217 = vperm.xlu2 %410, %v557_v6   ;;  %197 = vperm.xlu1 %408, %v557_v6  }
  0x9c   : > { %177 = vperm.xlu0 %406, %v557_v6  }
  0xa3   : > { %411 = vset.pattern.permute.xlu2 %v482_v7  ;;  %409 = vset.pattern.permute.xlu1 %v483_v8 }
  0xa4   : > { %407 = vset.pattern.permute.xlu0 %v484_v9  ;;  %227 = vperm.xlu2 %411, %v557_v6  }
  0xa5   : > { %207 = vperm.xlu1 %409, %v557_v6   ;;  %187 = vperm.xlu0 %407, %v557_v6  }
  0xad   : > { %412 = vset.pattern.permute.xlu0 %v482_v7 }
  0xf5   : > { %v218_v12 = vpop.permute.xlu2 %217 }
  0xf6   : > { %vm220_vm4 = vcmp.ge.f32.partialorder %v218_v12, %v557_v6 }
  0xf7   : > { %v354_v27 = vsel %vm220_vm4, 1.0, %v485_v13 }
  0xf8   : > { %v224_v31 = vmul.f32 %v354_v27, %v218_v12 }
  0xfe   : > { %v228_v22 = vpop.permute.xlu2 %227 }
  0xff   : > { %vm230_vm5 = vcmp.ge.f32.partialorder %v228_v22, %v557_v6 }
 0x100   : > { %v355_v34 = vsel %vm230_vm5, 1.0, %v485_v13 }
 0x101   : > { %v234_v37 = vmul.f32 %v355_v34, %v228_v22 }
 0x10d   : > { %v198_v10 = vpop.permute.xlu1 %197 }
 0x10e   : > { %v178_v11 = vpop.permute.xlu0 %177  ;;  %vm200_vm1 = vcmp.ge.f32.partialorder %v198_v10, %v557_v6 }
 0x10f   : > { %vm180_vm0 = vcmp.ge.f32.partialorder %v178_v11, %v557_v6  ;;  %v352_v17 = vsel %vm200_vm1, 1.0, %v485_v13 }
 0x110   : > { %v350_v14 = vsel %vm180_vm0, 1.0, %v485_v13  ;;  %v204_v24 = vmul.f32 %v352_v17, %v198_v10 }
 0x111   : > { %v184_v19 = vmul.f32 %v350_v14, %v178_v11 }
 0x117   : > { %v208_v15 = vpop.permute.xlu1 %207  ;;  %v188_v16 = vpop.permute.xlu0 %187 }
 0x118   : > { %vm210_vm2 = vcmp.ge.f32.partialorder %v208_v15, %v557_v6  ;;  %vm190_vm3 = vcmp.ge.f32.partialorder %v188_v16, %v557_v6 }
 0x119   : > { %v351_v18 = vsel %vm190_vm3, 1.0, %v485_v13  ;;  %v353_v23 = vsel %vm210_vm2, 1.0, %v485_v13 }
 0x11a   : > { %v193_v20 = vadd.f32 %v351_v18, %v350_v14  ;;  %v194_v21 = vmul.f32 %v351_v18, %v188_v16  ;;  %v214_v28 = vmul.f32 %v353_v23, %v208_v15 }
 0x11c   : > { %v195_v25 = vadd.f32 %v194_v21, %v184_v19  ;;  %v203_v26 = vadd.f32 %v352_v17, %v193_v20 }
 0x11e   : > { %v205_v29 = vadd.f32 %v204_v24, %v195_v25  ;;  %v213_v30 = vadd.f32 %v353_v23, %v203_v26 }
 0x120   : > { %v215_v32 = vadd.f32 %v214_v28, %v205_v29  ;;  %v223_v33 = vadd.f32 %v354_v27, %v213_v30 }
 0x122   : > { %v225_v35 = vadd.f32 %v224_v31, %v215_v32  ;;  %v233_v36 = vadd.f32 %v355_v34, %v223_v33 }
 0x124   : > { %v236_v38 = vmul.f32 %v233_v36, %v557_v6  ;;  %v235_v39 = vadd.f32 %v234_v37, %v225_v35 }
 0x126   : > { %v237_v40 = vadd.f32 1.0, %v236_v38 }
 0x128   : > { %vm238_vm7 = vcmp.gt.f32.partialorder %v237_v40, %v235_v39 }
 0x129   : > { %v356_v41 = vsel %vm238_vm7, 1.0, %v485_v13 }
 0x12a   : > { %v242_v42 = vsel %vm241_vm6, %v356_v41, 0.0  ;;  %v245_v43 = vmul.f32 %v356_v41, %v557_v6 }
 0x12b   : > { %243 = vadd.xlane.f32.xlu1 %v242_v42 }
 0x12c   : > { %v246_v44 = vsel %vm241_vm6, %v245_v43, 0.0 }
 0x12d   : > { %247 = vadd.xlane.f32.xlu2 %v246_v44 }
 0x19e   : > { %v244_v45 = vpop.xlane.xlu1 %243 }
 0x19f   : > { %413 = vrcp.f32 %v244_v45  ;;  %v261_v49 = vand.u32 2147483648, %v244_v45  ;;  %v259_v51 = vand.u32 2147483647, %v244_v45  ;;  %vm255_vm9 = vweird.f32 %v244_v45 }
 0x1a0   : > { %v248_v52 = vpop.xlane.xlu2 %247 }
 0x1a1   : > { %v262_v54 = vor.u32 1.1754944e-38, %v261_v49  ;;  %v357_v55 = vadd.f32 -1.0, %v248_v52  ;;  %vm260_vm11 = vcmp.eq.f32.partialorder %v259_v51, 8.507059e+37 }
 0x1a5   : > { %v414_v46 = vpop.eup %413 }
 0x1a6   : > { %v251_v47 = vmul.f32 %v414_v46, %v244_v45  ;;  %vm256_vm8 = vweird.f32 %v414_v46 }
 0x1a7   : > { %vm257_vm10 = vmor %vm255_vm9, %vm256_vm8 }
 0x1a8   : > { %v252_v48 = vsub.f32 1.0, %v251_v47 }
 0x1aa   : > { %v253_v50 = vmul.f32 %v414_v46, %v252_v48 }
 0x1ac   : > { %v254_v53 = vadd.f32 %v414_v46, %v253_v50 }
 0x1ae   : > { %v258_v56 = vsel %vm257_vm10, %v414_v46, %v254_v53 }
 0x1af   : > { %v263_v57 = vsel %vm260_vm11, %v262_v54, %v258_v56 }
 0x1b0   : > { %v264_v58 = vmul.f32 %v357_v55, %v263_v57 }
 0x1b2   : > { %v265_v59 = vsub.f32 %v557_v6, %v264_v58 }
 0x1b4   : > { %v266_v60 = vmax.f32 %v265_v59, 0.0 }
 0x1b6   : > { %267 = vst.msk [vmem:[%s144_s5] sm:$0x1] %vm241_vm6, %v266_v60 }
 0x1b7   : > { %442 = shalt.err (!%p439_p3)
}
 0x1b8   : > { %360 = dma.vmem_to_hbm [thread:$0]  (%p539_p5), %s280_s6, 16, %s282_s7, %s269_s8  }
 0x1b9 PF: > { %p366_p4 = scmp.ge.s32.totalorder %s477_s12, 2  ;;  %s293_s24 = sand.u32 1, %s465_s9  }
 0x1ba   : > { %s294_s25 = scalar_lea.sflag [#allocation3], %s293_s24 }
 0x1bb   : > { %p363_p7 = pnand %p366_p4, %p543_p6 }
 0x1bd   : > { %p364_p8 = pneg %p363_p7 }
 0x1bf   : > { %460 = dma.done.wait (%p364_p8), %s294_s25, 16  }
 0x1c0   : > { %462 = vsyncadd (%p364_p8), %s294_s25, 4294967280  ;;  %p12_p9 = scmp.ge.s32.totalorder %s526_s15, 4   ;;  %s614_s9 = smov %s469_s10 }
 0x1c1   : > { %s615_s10 = smov %s473_s11  ;;  %s616_s11 = smov %s537_s18 }
 0x1c2   : > { %s617_s12 = smov %s526_s15  ;;  %14 = sbr.rel (!%p12_p9) target bundleno = 3 (0x3), region = 66 }
 0x1c7   :  { %299 = vsyncpa [#allocation3], 1 }
 0x1c8   :  { %301 = vsyncpa [#allocation3 + $0x1], 1 }

</bundles_post_ra>
